<compile_context>
chip_gen: v5e
topology: v5e:2x2
jax: 0.10.0
libtpu: 0.0.40
codegen_flags: <defaults>
</compile_context>

<pallas_src>
import functools
import math

import jax
import jax.numpy as jnp
from jax.experimental import pallas as pl
from jax.experimental.pallas import tpu as pltpu


def _build_pe(d_model: int, max_len: int, dtype=jnp.float32) -> jnp.ndarray:
    """Deterministic positional-encoding buffer, shape [max_len, 1, d_model]."""
    assert d_model % 2 == 0, "d_model must be even (same assumption as the PyTorch module)"
    position = jnp.arange(max_len, dtype=jnp.float32)[:, None]               # [L, 1]
    div_term = jnp.exp(
        jnp.arange(0, d_model, 2, dtype=jnp.float32) * (-math.log(10000.0) / d_model)
    )                                                                        # [D/2]
    angles = position * div_term                                             # [L, D/2]
    pe = jnp.zeros((max_len, d_model), dtype=jnp.float32)
    pe = pe.at[:, 0::2].set(jnp.sin(angles))
    pe = pe.at[:, 1::2].set(jnp.cos(angles))
    return pe[:, None, :].astype(dtype)                                      # [L, 1, D]


def _pe_add_kernel(x_ref, pe_ref, o_ref, *, batches_in_tile: int, d_model: int):
    # x_ref / o_ref : (TILE_S, batches_in_tile * D)  lane-dense row slab
    # pe_ref        : (TILE_S, D)                    compact, shared by all batches
    #
    # Per-batch-chunk add: never materializes a (TILE_S, B*D) pe replica (which would
    # round-trip through VMEM and add ~50% on-chip ld/st traffic on this HBM-bound add).
    pe = pe_ref[...]
    for b in range(batches_in_tile):            # static Python loop, unrolled at trace time
        sl = slice(b * d_model, (b + 1) * d_model)   # static slice: free view when D % 128 == 0
        o_ref[:, sl] = x_ref[:, sl] + pe


_TARGET_TILE_BYTES = 2 << 20   # ~2 MiB x-tile: ~85% of HBM roofline (measured on v6e) and
                               # 2x(in)+2x(out) buffering fits v5e's 16 MiB default scoped VMEM.
_MAX_ROW_SLAB_BYTES = 8 << 20  # if 8 rows of all batches exceed this, also tile the lane dim
                               # (protects v7x's halved 64 MiB VMEM for huge B*D).


def _choose_row_tile(S: int, row_bytes: int) -> int:
    """Row-tile size: multiple of 8 (sublanes), ~_TARGET_TILE_BYTES per x tile."""
    if S <= 8:
        return S
    t = min(S, max(1, _TARGET_TILE_BYTES // max(row_bytes, 1)))
    tile_s = max(8, (t // 8) * 8)
    # v7x has 2 TensorCores sharing HBM: make sure the "parallel" grid axis has at least
    # 2 steps whenever the sequence can be split at sublane (8-row) granularity.
    if pl.cdiv(S, tile_s) < 2 and S >= 16:
        half = (((S + 1) // 2) + 7) // 8 * 8
        tile_s = min(tile_s, half)
    return tile_s


def positional_encoding_forward(x: jnp.ndarray, pe: jnp.ndarray) -> jnp.ndarray:
    """x: [S, B, D]; pe: [max_len, 1, D]. Returns x + pe[:S] (dropout p=0 == identity)."""
    S, B, D = x.shape
    itemsize = jnp.dtype(x.dtype).itemsize

    # Optional lane-dimension tiling in whole-batch (multiple-of-D) chunks; only when an
    # 8-row slab of all B batches is huge and D % 128 == 0 (BlockSpec (8,128) rule).
    bt = B
    if 8 * B * D * itemsize > _MAX_ROW_SLAB_BYTES and D % 128 == 0 and B > 1:
        bt = min(B, max(1, _MAX_ROW_SLAB_BYTES // (8 * D * itemsize)))

    # Lane-dense 2D views (contiguous reshape / slice at the XLA level).
    x2 = x.reshape(S, B * D)                    # [S, B*D]
    pe2 = pe[:S, 0, :].astype(x.dtype)          # [S, D]  (compact: HBM pe traffic = x/B)

    row_bytes = bt * D * itemsize
    tile_s = _choose_row_tile(S, row_bytes)
    grid = (pl.cdiv(S, tile_s), pl.cdiv(B, bt))

    x_tile_bytes = tile_s * bt * D * itemsize
    pe_tile_bytes = tile_s * D * itemsize
    # Explicit VMEM budget (2x-buffered x-in + 2x-buffered out + 2x-buffered pe + slack) so
    # one tile policy is portable across v5e (16 MiB default scoped) / v6e / v7x (32 MiB).
    vmem_limit = int(min(max(4 * x_tile_bytes + 2 * pe_tile_bytes + (2 << 20), 8 << 20),
                         100 << 20))

    cost = pl.CostEstimate(
        flops=S * B * D,
        transcendentals=0,
        bytes_accessed=2 * S * B * D * itemsize + S * D * itemsize,
    )

    out2 = pl.pallas_call(
        functools.partial(_pe_add_kernel, batches_in_tile=bt, d_model=D),
        out_shape=jax.ShapeDtypeStruct((S, B * D), x.dtype),
        grid_spec=pltpu.PrefetchScalarGridSpec(
            num_scalar_prefetch=0,
            grid=grid,
            in_specs=[
                pl.BlockSpec((tile_s, bt * D), lambda i, j: (i, j)),   # x row/lane tile
                pl.BlockSpec((tile_s, D), lambda i, j: (i, 0)),        # compact pe rows
            ],
            out_specs=pl.BlockSpec((tile_s, bt * D), lambda i, j: (i, j)),
        ),
        compiler_params=pltpu.CompilerParams(
            dimension_semantics=("parallel", "parallel"),
            vmem_limit_bytes=vmem_limit,
        ),
        cost_estimate=cost,
    )(x2, pe2)

    # TODO(synk): dropout with p > 0 would need pltpu.prng_seed(seed ^ program_id) per tile
    # plus pltpu.prng_random_bits masking; module default p = 0.0 -> identity.
    return out2.reshape(S, B, D)


if __name__ == "__main__":
    # Small shapes consistent with forward: seq=8, batch=2, d_model=32
    seq_len, batch, d_model = 8, 2, 32
    max_len = 64

    key = jax.random.PRNGKey(0)
    x = jax.random.normal(key, (seq_len, batch, d_model), dtype=jnp.float32)

    pe = _build_pe(d_model, max_len)

    out = positional_encoding_forward(x, pe)
    out = jax.block_until_ready(out)

    # correctness check against plain-JAX reference
    ref = x + pe[:seq_len]
    assert out.shape == (seq_len, batch, d_model)
    assert jnp.allclose(out, ref, atol=1e-6), "mismatch vs reference"

    print("KERNEL_OK")
</pallas_src>

<mosaic_0001>
module attributes {stable_mosaic.version = 11 : i64} {
  func.func @_pe_add_kernel(%arg0: i32, %arg1: i32, %arg2: memref<8x64xf32, #tpu.memory_space<vmem>>, %arg3: memref<8x32xf32, #tpu.memory_space<vmem>>, %arg4: memref<8x64xf32, #tpu.memory_space<vmem>>) attributes {dimension_semantics = [#tpu.dimension_semantics<parallel>, #tpu.dimension_semantics<parallel>], iteration_bounds = array<i64: 1, 1>, scalar_prefetch = 0 : i64, scratch_operands = 0 : i64, tpu.core_type = #tpu.core_type<tc>, window_params = [{transform_indices = @transform_0, window_bounds = array<i64: 8, 64>}, {transform_indices = @transform_1, window_bounds = array<i64: 8, 32>}, {transform_indices = @transform_2, window_bounds = array<i64: 8, 64>}]} {
    %c0 = arith.constant 0 : index
    %c0_0 = arith.constant 0 : index
    %0 = vector.load %arg3[%c0, %c0_0] : memref<8x32xf32, #tpu.memory_space<vmem>>, vector<8x32xf32>
    %c0_1 = arith.constant 0 : index
    %c0_2 = arith.constant 0 : index
    %1 = vector.load %arg2[%c0_1, %c0_2] : memref<8x64xf32, #tpu.memory_space<vmem>>, vector<8x32xf32>
    %2 = arith.addf %1, %0 : vector<8x32xf32>
    %c0_3 = arith.constant 0 : index
    %c0_4 = arith.constant 0 : index
    %3 = vector.load %arg4[%c0_3, %c0_4] : memref<8x64xf32, #tpu.memory_space<vmem>>, vector<8x32xf32>
    tpu.vector_store %arg4[%c0_3, %c0_4], %2 {strides = array<i32>} : memref<8x64xf32, #tpu.memory_space<vmem>>, vector<8x32xf32>,
    %c0_5 = arith.constant 0 : index
    %c32 = arith.constant 32 : index
    %4 = vector.load %arg2[%c0_5, %c32] : memref<8x64xf32, #tpu.memory_space<vmem>>, vector<8x32xf32>
    %5 = arith.addf %4, %0 : vector<8x32xf32>
    %c0_6 = arith.constant 0 : index
    %c32_7 = arith.constant 32 : index
    %6 = vector.load %arg4[%c0_6, %c32_7] : memref<8x64xf32, #tpu.memory_space<vmem>>, vector<8x32xf32>
    tpu.vector_store %arg4[%c0_6, %c32_7], %5 {strides = array<i32>} : memref<8x64xf32, #tpu.memory_space<vmem>>, vector<8x32xf32>,
    return
  }
  func.func @transform_0(%arg0: i32, %arg1: i32) -> (i32, i32) {
    %c0_i32 = arith.constant 0 : i32
    return %arg0, %arg1 : i32, i32
  }
  func.func @transform_1(%arg0: i32, %arg1: i32) -> (i32, i32) {
    %c0_i32 = arith.constant 0 : i32
    %c0_i32_0 = arith.constant 0 : i32
    return %arg0, %c0_i32 : i32, i32
  }
  func.func @transform_2(%arg0: i32, %arg1: i32) -> (i32, i32) {
    %c0_i32 = arith.constant 0 : i32
    return %arg0, %arg1 : i32, i32
  }
}

</mosaic_0001>

<bundles_post_ra>
// kernel: tpu_custom_call.1
= control target key start
LH: loop header
LB: loop body
LE: loop exit
PB: predicated region body
PF: predicated region fallthrough
CT: control target
= control target key end

     0   :  { %7 = vsyncpa [#allocation3], 0  ;;  %s181_s0 = inlined_call_operand.hbm [shape: f32[8,64], index: 0, kind: input, shape index: {}]   ;;  %s182_s1 = inlined_call_operand.hbm [shape: f32[8,32], index: 1, kind: input, shape index: {}]   ;;  %s183_s2 = inlined_call_operand.hbm [shape: f32[8,64], index: 2, kind: output, shape index: {}]  }
   0x1   :  { %8 = vsyncpa [#allocation6], 0 }
   0x2   :  { %9 = vsyncpa [#allocation4], 0  ;;  %s15_s11 = sshll.u32 %s181_s0, 4  ;;  %s153_s12 = smov [#allocation2]   ;;  %s16_s11 = int_to_ptr.hbm [resolvable:$true] %s15_s11 }
   0x3   :  { %s17_s13 = sshll.u32 %s153_s12, 4  ;;  %s26_s16 = sshll.u32 %s182_s1, 4  ;;  %s18_s13 = int_to_ptr.vmem [resolvable:$true] %s17_s13  ;;  %s27_s16 = int_to_ptr.hbm [resolvable:$true] %s26_s16 }
   0x4   :  { %20 = dma.hbm_to_vmem [thread:$0]  %s16_s11, 128, %s18_s13, [#allocation3]  }
   0x5   :  { %s154_s17 = smov [#allocation5]  }
   0x6   :  { %s28_s18 = sshll.u32 %s154_s17, 4  ;;  %s29_s18 = int_to_ptr.vmem [resolvable:$true] %s28_s18 }
   0x7   :  { %31 = dma.hbm_to_vmem [thread:$0]  %s27_s16, 128, %s29_s18, [#allocation6]  }
   0x8   :  { %147 = dma.done.wait [#allocation3], 128  }
   0x9   :  { %148 = vsyncadd [#allocation3], 4294967168 }
   0xa   :  { %149 = dma.done.wait [#allocation6], 128  }
   0xb   :  { %150 = vsyncadd [#allocation6], 4294967168  ;;  %v40_v0 = vld [vmem:[#allocation5] sm:$0xff]  ;;  %v41_v1 = vld [vmem:[#allocation2] sm:$0xff]  ;;  %vm43_vm0 = vcmask 261120   ;;  %s155_s0 = smov 32  }
   0xc   :  { %v42_v2 = vadd.f32 %v41_v1, %v40_v0  ;;  %47 = vrot.lane.b32.xlu0 %v40_v0, %s155_s0  ;;  %s156_s19 = smov [#allocation7]   ;;  %s60_s22 = sshll.u32 %s183_s2, 4  ;;  %vm51_vm1 = vcmask 523520   ;;  %s61_s22 = int_to_ptr.hbm [resolvable:$true] %s60_s22 }
   0xd   :  { %s58_s20 = sshll.u32 %s156_s19, 4  ;;  %s59_s20 = int_to_ptr.vmem [resolvable:$true] %s58_s20 }
   0xe   :  { %44 = vst.msk [vmem:[#allocation7] sm:$0xff] %vm43_vm0, %v42_v2 }
  0x7e   :  { %v48_v3 = vpop.permute.xlu0 %47 }
  0x7f   :  { %v50_v4 = vadd.f32 %v48_v3, %v41_v1 }
  0x81   :  { %52 = vst.msk [vmem:[#allocation7] sm:$0xff] %vm51_vm1, %v50_v4 }
  0x82   :  { %63 = dma.vmem_to_hbm [thread:$0]  %s59_s20, 128, %s61_s22, [#allocation4]  }
  0x83   :  { %151 = dma.done.wait [#allocation4], 128  }
  0x84   :  { %152 = vsyncadd [#allocation4], 4294967168 }
  0x85   :  { %68 = vsyncpa [#allocation3], 1 }
  0x86   :  { %69 = vsyncpa [#allocation6], 1 }
  0x87   :  { %70 = vsyncpa [#allocation4], 1 }

</bundles_post_ra>
